<compile_context>
chip_gen: v7x
topology: tpu7x:2x2x1
jax: 0.10.0
libtpu: 0.0.40
codegen_flags: <defaults>
</compile_context>

<pallas_src>
import jax
import jax.numpy as jnp
from jax.experimental import pallas as pl
from jax.experimental.pallas import tpu as pltpu

IN_STATES = 2
H1_NODES = 16
H2_NODES = 8
OUT_ACTIONS = 3

# Per-step footprint at 32768 lanes: ~2 MiB of double-buffered blocks + ~10 MiB of f32/bf16
# intermediates -> comfortably under the explicit 48 MiB VMEM limit on every generation
# (v5e/v6e 128 MiB physical, v7x 64 MiB physical per TC).
MAX_TILE_B = 32768


def _round_up(n, m):
    return ((n + m - 1) // m) * m


def dqn_kernel(xp_ref, w1_ref, b1_ref, w2_ref, b2_ref, w3_ref, b3_ref, o_ref):
    # xp_ref: (1, TILE_B) uint32 -- bf16 feature0 in the low 16 bits, feature1 in the high
    # 16 bits of every lane. A bf16 bit pattern placed in the top half of a 32-bit word IS
    # the equal-valued float32, so unpacking is just shift/mask + bitcast (pure VPU work).
    xu = xp_ref[...]
    x0 = pltpu.bitcast(jnp.left_shift(xu, jnp.uint32(16)), jnp.float32)            # (1, TB)
    x1 = pltpu.bitcast(jnp.bitwise_and(xu, jnp.uint32(0xFFFF0000)), jnp.float32)   # (1, TB)

    # fc1: K=2 contraction is >98% zero padding on the MXU -> two VPU FMAs (outer product).
    w1 = w1_ref[...]                                                 # (16, 2) f32
    h1 = w1[:, 0:1] * x0 + w1[:, 1:2] * x1 + b1_ref[...]
    h1 = jnp.maximum(h1, 0.0)                                        # (16, TB) f32

    # fc2 / out: bf16 operands on the MXU (native single-pass path), f32 accumulation.
    h2 = jnp.dot(w2_ref[...], h1.astype(jnp.bfloat16),
                 preferred_element_type=jnp.float32) + b2_ref[...]
    h2 = jnp.maximum(h2, 0.0)                                        # (8, TB) f32
    out = jnp.dot(w3_ref[...], h2.astype(jnp.bfloat16),
                  preferred_element_type=jnp.float32) + b3_ref[...]
    o_ref[...] = out.astype(o_ref.dtype)                             # (3, TB) lane-dense


def _pack_inputs(x):
    """(B, 2) float -> (B,) uint32: bf16 feature0 in the low 16 bits, feature1 in the high.

    Pure elementwise pack (no XLA transpose pass over x); fuses with the bf16 cast.
    """
    xb = jax.lax.bitcast_convert_type(x.astype(jnp.bfloat16), jnp.uint16)   # (B, 2) u16
    lo = xb[:, 0].astype(jnp.uint32)
    hi = xb[:, 1].astype(jnp.uint32)
    return lo | (hi << 16)


def dqn_forward_pallas(x, params, *, tile_b=None, transposed_output=False):
    """x: (B, IN_STATES). params: PyTorch layout (w: (fan_out, fan_in), b: (fan_out,))."""
    w1, b1, w2, b2, w3, b3 = params
    B = x.shape[0]

    if tile_b is None:
        # Biggest tile that fits comfortably, but >= 2 grid steps once B > 128 so both of
        # v7x's TensorCores get a share of the batch.
        b_min = _round_up(max(B, 1), 128)
        tile_b = min(MAX_TILE_B, max(128, _round_up(pl.cdiv(b_min, 2), 128)))
    else:
        tile_b = _round_up(max(tile_b, 128), 128)
    b_pad = _round_up(max(B, 1), tile_b)
    num_tiles = b_pad // tile_b

    xp = _pack_inputs(x)                                             # (B,) uint32
    xp = jnp.pad(xp, (0, b_pad - B)).reshape(1, b_pad)               # zero-pad extra lanes

    w1f = w1.astype(jnp.float32)                                     # fc1 runs on the VPU
    w2b = w2.astype(jnp.bfloat16)                                    # MXU operands in bf16
    w3b = w3.astype(jnp.bfloat16)
    b1c = b1.reshape(H1_NODES, 1).astype(jnp.float32)
    b2c = b2.reshape(H2_NODES, 1).astype(jnp.float32)
    b3c = b3.reshape(OUT_ACTIONS, 1).astype(jnp.float32)

    def full(arr):  # whole (tiny) array resident in VMEM for every grid step
        return pl.BlockSpec(arr.shape, lambda i: (0, 0))

    flops = 2 * b_pad * (IN_STATES * H1_NODES + H1_NODES * H2_NODES + H2_NODES * OUT_ACTIONS)
    bytes_accessed = (b_pad * (4 + 4 * OUT_ACTIONS)
                      + 4 * (w1f.size + b1c.size + b2c.size + b3c.size)
                      + 2 * (w2b.size + w3b.size))

    out_t = pl.pallas_call(
        dqn_kernel,
        out_shape=jax.ShapeDtypeStruct((OUT_ACTIONS, b_pad), jnp.float32),
        grid_spec=pl.GridSpec(
            grid=(num_tiles,),
            in_specs=[
                pl.BlockSpec((1, tile_b), lambda i: (0, i)),         # packed bf16 inputs
                full(w1f), full(b1c),
                full(w2b), full(b2c),
                full(w3b), full(b3c),
            ],
            out_specs=pl.BlockSpec((OUT_ACTIONS, tile_b), lambda i: (0, i)),
        ),
        compiler_params=pltpu.CompilerParams(
            dimension_semantics=("parallel",),          # shard batch tiles across v7x's TCs
            vmem_limit_bytes=48 * 1024 * 1024,          # > 16/32 MiB defaults, < v7x physical
        ),
        cost_estimate=pl.CostEstimate(
            flops=int(flops), transcendentals=0, bytes_accessed=int(bytes_accessed)),
    )(xp, w1f, b1c, w2b, b2c, w3b, b3c)

    out_t = out_t[:, :B]                                             # (3, B) lane-dense
    if transposed_output:
        return out_t              # keep (3, B) downstream: skips an extra HBM pass at big B
    return out_t.T                                                   # PyTorch layout (B, 3)


def dqn_forward(x, params, *, tile_b=None, use_pallas=None, transposed_output=False):
    """Forward pass matching the PyTorch DQN: (B, IN_STATES) -> (B, OUT_ACTIONS)."""
    B = x.shape[0]
    if use_pallas is None:
        use_pallas = B >= 1024    # tiny batches: launch + pack overhead dominates -> plain jnp
    if not use_pallas:
        out = ref_forward(x, params)
        return out.T if transposed_output else out
    return dqn_forward_pallas(x, params, tile_b=tile_b, transposed_output=transposed_output)


def init_params(key):
    # PyTorch nn.Linear layout: weight (fan_out, fan_in), bias (fan_out,),
    # init U(-1/sqrt(fan_in), 1/sqrt(fan_in)).
    def linear(k, fan_in, fan_out):
        kw, kb = jax.random.split(k)
        bound = 1.0 / float(fan_in) ** 0.5
        w = jax.random.uniform(kw, (fan_out, fan_in), jnp.float32, -bound, bound)
        b = jax.random.uniform(kb, (fan_out,), jnp.float32, -bound, bound)
        return w, b

    k1, k2, k3 = jax.random.split(key, 3)
    w1, b1 = linear(k1, IN_STATES, H1_NODES)
    w2, b2 = linear(k2, H1_NODES, H2_NODES)
    w3, b3 = linear(k3, H2_NODES, OUT_ACTIONS)
    return (w1, b1, w2, b2, w3, b3)


def ref_forward(x, params, *, mirror_kernel_precision=False):
    """f32 reference. With mirror_kernel_precision=True it reproduces the kernel's bf16
    casts (input, h1/h2 and MXU weight operands) so the comparison can stay tight."""
    w1, b1, w2, b2, w3, b3 = params
    hp = jax.lax.Precision.HIGHEST
    r = ((lambda a: a.astype(jnp.bfloat16).astype(jnp.float32))
         if mirror_kernel_precision else (lambda a: a))
    h = jnp.maximum(jnp.dot(r(x), w1.T, precision=hp) + b1, 0.0)
    h = jnp.maximum(jnp.dot(r(h), r(w2).T, precision=hp) + b2, 0.0)
    return jnp.dot(r(h), r(w3).T, precision=hp) + b3


if __name__ == "__main__":
    key = jax.random.PRNGKey(0)
    kp, kx = jax.random.split(key)
    params = init_params(kp)

    # Small-shape test; force the Pallas path so the kernel actually runs.
    B = 8
    x = jax.random.normal(kx, (B, IN_STATES), jnp.float32)
    out = jax.block_until_ready(dqn_forward(x, params, use_pallas=True))
    assert out.shape == (B, OUT_ACTIONS)

    # Tight check against a reference that mirrors the kernel's bf16 operand casts.
    ref_mirror = ref_forward(x, params, mirror_kernel_precision=True)
    err_m = float(jnp.max(jnp.abs(out - ref_mirror)))
    assert jnp.allclose(out, ref_mirror, atol=2e-3, rtol=2e-3), err_m
    # Loose check against the pure-f32 PyTorch semantics (bf16 input/intermediate rounding).
    ref_f32 = ref_forward(x, params)
    err_f = float(jnp.max(jnp.abs(out - ref_f32)))
    assert jnp.allclose(out, ref_f32, atol=5e-2, rtol=5e-2), err_f

    # Multi-tile + padding path (B not a multiple of the tile, 4 grid steps), still small.
    B2 = 1000
    x2 = jax.random.normal(jax.random.PRNGKey(1), (B2, IN_STATES), jnp.float32)
    out2 = jax.block_until_ready(dqn_forward(x2, params, use_pallas=True, tile_b=256))
    ref2 = ref_forward(x2, params, mirror_kernel_precision=True)
    assert out2.shape == (B2, OUT_ACTIONS)
    assert jnp.allclose(out2, ref2, atol=2e-3, rtol=2e-3), float(jnp.max(jnp.abs(out2 - ref2)))

    print("KERNEL_OK")
</pallas_src>

<mosaic_0001>
module attributes {stable_mosaic.version = 11 : i64} {
  func.func @dqn_kernel(%arg0: i32, %arg1: memref<1x128xi32, #tpu.memory_space<vmem>>, %arg2: memref<16x2xf32, #tpu.memory_space<vmem>>, %arg3: memref<16x1xf32, #tpu.memory_space<vmem>>, %arg4: memref<8x16xbf16, #tpu.memory_space<vmem>>, %arg5: memref<8x1xf32, #tpu.memory_space<vmem>>, %arg6: memref<3x8xbf16, #tpu.memory_space<vmem>>, %arg7: memref<3x1xf32, #tpu.memory_space<vmem>>, %arg8: memref<3x128xf32, #tpu.memory_space<vmem>>) attributes {dimension_semantics = [#tpu.dimension_semantics<parallel>], iteration_bounds = array<i64: 1>, scalar_prefetch = 0 : i64, scratch_operands = 0 : i64, tpu.core_type = #tpu.core_type<tc>, window_params = [{transform_indices = @transform_0, window_bounds = array<i64: 1, 128>}, {pipeline_mode = #tpu.pipeline_mode<synchronous>, transform_indices = @transform_1, window_bounds = array<i64: 16, 2>}, {pipeline_mode = #tpu.pipeline_mode<synchronous>, transform_indices = @transform_2, window_bounds = array<i64: 16, 1>}, {pipeline_mode = #tpu.pipeline_mode<synchronous>, transform_indices = @transform_3, window_bounds = array<i64: 8, 16>}, {pipeline_mode = #tpu.pipeline_mode<synchronous>, transform_indices = @transform_4, window_bounds = array<i64: 8, 1>}, {pipeline_mode = #tpu.pipeline_mode<synchronous>, transform_indices = @transform_5, window_bounds = array<i64: 3, 8>}, {pipeline_mode = #tpu.pipeline_mode<synchronous>, transform_indices = @transform_6, window_bounds = array<i64: 3, 1>}, {transform_indices = @transform_7, window_bounds = array<i64: 3, 128>}]} {
    %c0 = arith.constant 0 : index
    %c0_0 = arith.constant 0 : index
    %0 = vector.load %arg1[%c0, %c0_0] : memref<1x128xi32, #tpu.memory_space<vmem>>, vector<1x128xi32>
    %c16_i32 = arith.constant 16 : i32
    %1 = vector.broadcast %c16_i32 : i32 to vector<1x128xi32>
    %2 = arith.shli %0, %1 : vector<1x128xi32>
    %3 = tpu.bitcast %2 : vector<1x128xi32> -> vector<1x128xf32>
    %c-65536_i32 = arith.constant -65536 : i32
    %4 = vector.broadcast %c-65536_i32 : i32 to vector<1x128xi32>
    %5 = arith.andi %0, %4 : vector<1x128xi32>
    %6 = tpu.bitcast %5 : vector<1x128xi32> -> vector<1x128xf32>
    %c0_1 = arith.constant 0 : index
    %c0_2 = arith.constant 0 : index
    %7 = vector.load %arg2[%c0_1, %c0_2] : memref<16x2xf32, #tpu.memory_space<vmem>>, vector<16x2xf32>
    %8 = vector.extract_strided_slice %7 {offsets = [0, 0], sizes = [16, 1], strides = [1, 1]} : vector<16x2xf32> to vector<16x1xf32>
    %9 = vector.broadcast %8 : vector<16x1xf32> to vector<16x128xf32>
    %10 = vector.broadcast %3 : vector<1x128xf32> to vector<16x128xf32>
    %11 = arith.mulf %9, %10 : vector<16x128xf32>
    %12 = vector.extract_strided_slice %7 {offsets = [0, 1], sizes = [16, 1], strides = [1, 1]} : vector<16x2xf32> to vector<16x1xf32>
    %13 = vector.broadcast %12 : vector<16x1xf32> to vector<16x128xf32>
    %14 = vector.broadcast %6 : vector<1x128xf32> to vector<16x128xf32>
    %15 = arith.mulf %13, %14 : vector<16x128xf32>
    %16 = arith.addf %11, %15 : vector<16x128xf32>
    %c0_3 = arith.constant 0 : index
    %c0_4 = arith.constant 0 : index
    %17 = vector.load %arg3[%c0_3, %c0_4] : memref<16x1xf32, #tpu.memory_space<vmem>>, vector<16x1xf32>
    %18 = vector.broadcast %17 : vector<16x1xf32> to vector<16x128xf32>
    %19 = arith.addf %16, %18 : vector<16x128xf32>
    %cst = arith.constant 0.000000e+00 : f32
    %20 = vector.broadcast %cst : f32 to vector<16x128xf32>
    %21 = arith.maximumf %19, %20 : vector<16x128xf32>
    %c0_5 = arith.constant 0 : index
    %c0_6 = arith.constant 0 : index
    %22 = vector.load %arg4[%c0_5, %c0_6] : memref<8x16xbf16, #tpu.memory_space<vmem>>, vector<8x16xbf16>
    %23 = arith.truncf %21 : vector<16x128xf32> to vector<16x128xbf16>
    %cst_7 = arith.constant dense<0.000000e+00> : vector<8x128xf32>
    %24 = tpu.matmul %22, %23, %cst_7 {dimension_numbers = #tpu.dot_dimension_numbers<[1], [0], [0], [1], [0, 0, 1, 1], [], []>} : vector<8x16xbf16>, vector<16x128xbf16>, vector<8x128xf32> -> vector<8x128xf32>
    %c0_8 = arith.constant 0 : index
    %c0_9 = arith.constant 0 : index
    %25 = vector.load %arg5[%c0_8, %c0_9] : memref<8x1xf32, #tpu.memory_space<vmem>>, vector<8x1xf32>
    %26 = vector.broadcast %25 : vector<8x1xf32> to vector<8x128xf32>
    %27 = arith.addf %24, %26 : vector<8x128xf32>
    %cst_10 = arith.constant 0.000000e+00 : f32
    %28 = vector.broadcast %cst_10 : f32 to vector<8x128xf32>
    %29 = arith.maximumf %27, %28 : vector<8x128xf32>
    %c0_11 = arith.constant 0 : index
    %c0_12 = arith.constant 0 : index
    %30 = vector.load %arg6[%c0_11, %c0_12] : memref<3x8xbf16, #tpu.memory_space<vmem>>, vector<3x8xbf16>
    %31 = arith.truncf %29 : vector<8x128xf32> to vector<8x128xbf16>
    %cst_13 = arith.constant dense<0.000000e+00> : vector<3x128xf32>
    %32 = tpu.matmul %30, %31, %cst_13 {dimension_numbers = #tpu.dot_dimension_numbers<[1], [0], [0], [1], [0, 0, 1, 1], [], []>} : vector<3x8xbf16>, vector<8x128xbf16>, vector<3x128xf32> -> vector<3x128xf32>
    %c0_14 = arith.constant 0 : index
    %c0_15 = arith.constant 0 : index
    %33 = vector.load %arg7[%c0_14, %c0_15] : memref<3x1xf32, #tpu.memory_space<vmem>>, vector<3x1xf32>
    %34 = vector.broadcast %33 : vector<3x1xf32> to vector<3x128xf32>
    %35 = arith.addf %32, %34 : vector<3x128xf32>
    %c0_16 = arith.constant 0 : index
    %c0_17 = arith.constant 0 : index
    %36 = vector.load %arg8[%c0_16, %c0_17] : memref<3x128xf32, #tpu.memory_space<vmem>>, vector<3x128xf32>
    tpu.vector_store %arg8[%c0_16, %c0_17], %35 {strides = array<i32>} : memref<3x128xf32, #tpu.memory_space<vmem>>, vector<3x128xf32>,
    return
  }
  func.func @transform_0(%arg0: i32) -> (i32, i32) {
    %c0_i32 = arith.constant 0 : i32
    %c0_i32_0 = arith.constant 0 : i32
    return %c0_i32, %arg0 : i32, i32
  }
  func.func @transform_1(%arg0: i32) -> (i32, i32) {
    %c0_i32 = arith.constant 0 : i32
    %c0_i32_0 = arith.constant 0 : i32
    %c0_i32_1 = arith.constant 0 : i32
    return %c0_i32, %c0_i32_0 : i32, i32
  }
  func.func @transform_2(%arg0: i32) -> (i32, i32) {
    %c0_i32 = arith.constant 0 : i32
    %c0_i32_0 = arith.constant 0 : i32
    %c0_i32_1 = arith.constant 0 : i32
    return %c0_i32, %c0_i32_0 : i32, i32
  }
  func.func @transform_3(%arg0: i32) -> (i32, i32) {
    %c0_i32 = arith.constant 0 : i32
    %c0_i32_0 = arith.constant 0 : i32
    %c0_i32_1 = arith.constant 0 : i32
    return %c0_i32, %c0_i32_0 : i32, i32
  }
  func.func @transform_4(%arg0: i32) -> (i32, i32) {
    %c0_i32 = arith.constant 0 : i32
    %c0_i32_0 = arith.constant 0 : i32
    %c0_i32_1 = arith.constant 0 : i32
    return %c0_i32, %c0_i32_0 : i32, i32
  }
  func.func @transform_5(%arg0: i32) -> (i32, i32) {
    %c0_i32 = arith.constant 0 : i32
    %c0_i32_0 = arith.constant 0 : i32
    %c0_i32_1 = arith.constant 0 : i32
    return %c0_i32, %c0_i32_0 : i32, i32
  }
  func.func @transform_6(%arg0: i32) -> (i32, i32) {
    %c0_i32 = arith.constant 0 : i32
    %c0_i32_0 = arith.constant 0 : i32
    %c0_i32_1 = arith.constant 0 : i32
    return %c0_i32, %c0_i32_0 : i32, i32
  }
  func.func @transform_7(%arg0: i32) -> (i32, i32) {
    %c0_i32 = arith.constant 0 : i32
    %c0_i32_0 = arith.constant 0 : i32
    return %c0_i32, %arg0 : i32, i32
  }
}

</mosaic_0001>

<bundles_post_ra>
// kernel: tpu_custom_call.1
= control target key start
LH: loop header
LB: loop body
LE: loop exit
PB: predicated region body
PF: predicated region fallthrough
CT: control target
= control target key end

     0   :  { %v257_v1 = vmov 1   ;;  %v258_v2 = vmov 0   ;;  %s341_s0 = inlined_call_operand.vmem [shape: u32[1,128], index: 0, kind: input, shape index: {}]   ;;  %s342_s1 = inlined_call_operand.vmem [shape: f32[16,2], index: 1, kind: input, shape index: {}]   ;;  %s343_s2 = inlined_call_operand.vmem [shape: f32[16,1], index: 2, kind: input, shape index: {}]   ;;  %s344_s3 = inlined_call_operand.vmem [shape: bf16[8,16], index: 3, kind: input, shape index: {}]   ;;  %s345_s4 = inlined_call_operand.vmem [shape: f32[8,1], index: 4, kind: input, shape index: {}]   ;;  %s346_s5 = inlined_call_operand.vmem [shape: bf16[3,8], index: 5, kind: input, shape index: {}]   ;;  %s347_s6 = inlined_call_operand.vmem [shape: f32[3,1], index: 6, kind: input, shape index: {}]   ;;  %s348_s7 = inlined_call_operand.hbm [shape: f32[3,128], index: 7, kind: output, shape index: {}]  }
   0x1   :  { %v33_v0 = vld [vmem:[%s342_s1] sm:$0xff]  ;;  %231 = vset.pattern.permute.xlu1 %v257_v1  ;;  %230 = vset.pattern.permute.xlu0 %v258_v2 }
   0x2   :  { %52 = vperm.xlu1 %231, %v33_v0   ;;  %37 = vperm.xlu0 %230, %v33_v0  }
   0x3   :  { %12 = vsyncpa [#allocation3], 0  ;;  %v34_v3 = vld [vmem:[%s342_s1 + $0x8] sm:$0xff]  ;;  %v67_v4 = vld [vmem:[%s343_s2] sm:$0xff]  ;;  %v259_v8 = vmov 0.0   ;;  %vm260_vm0 = vmmov 0   ;;  %v45_v9 = vlaneseq }
   0x4   :  { %v68_v5 = vld [vmem:[%s343_s2 + $0x8] sm:$0xff]  ;;  %v85_v6 = vld [vmem:[%s345_s4] sm:$0xff]  ;;  %213 = vmatprep.subr.bf16.mxu0 %v259_v8  ;;  %219 = vmatprep.subr.bf16.mxu1 %v259_v8  ;;  %vm91_vm1 = vcmask 130048   ;;  %vm148_vm2 = vcmask 1043456   ;;  %vm144_vm3 = vcmask 64512  }
   0x5   :  { %v138_v7 = vld [vmem:[%s347_s6] sm:$0x7]  ;;  %215 = vmatprep.mubr.msk.bf16.mxu0 %vm260_vm0, %v259_v8  ;;  %221 = vmatprep.mubr.msk.bf16.mxu1 %vm260_vm0, %v259_v8  ;;  %v46_v10 = vshrl.u32 %v45_v9, 7 }
   0x6   :  { %56 = vperm.xlu1 %231, %v34_v3   ;;  %42 = vperm.xlu0 %230, %v34_v3   ;;  %v28_v11 = vld [vmem:[%s341_s0] sm:$0x1] }
   0x7   :  { %v47_v12 = vsub.s32 0, %v46_v10  ;;  %v31_v13 = vand.u32 4294901760, %v28_v11  ;;  %v29_v14 = vshll.u32 %v28_v11, 16  ;;  %v83_v34 = vld [vmem:[%s344_s3] sm:$0xf]  ;;  %s261_s3 = smov [#allocation2]  }
   0x8   :  { %v136_v44 = vld [vmem:[%s346_s5] sm:$0x3]  ;;  %s199_s14 = sshll.u32 %s261_s3, 4  ;;  %s200_s14 = int_to_ptr.vmem [resolvable:$true] %s199_s14 }
   0x9   :  { %v62_v15 = vrot.slane %v31_v13, %v47_v12  ;;  %v48_v16 = vrot.slane %v29_v14, %v47_v12  ;;  %s233_s15 = scalar_lea.vmem %s200_s14, 64  ;;  %p238_p1 = scmp.lt.s32.totalorder %s200_s14, %s200_s14 }
   0xa   :  { %232 = vset.pattern.permute.xlu1 %v258_v2  ;;  %71 = vperm.xlu0 %230, %v67_v4   ;;  %p234_p0 = scmp.ne.s32.totalorder %s200_s14, %s233_s15  ;;  %p239_p2 = scmp.lt.s32.totalorder %s233_s15, %s233_s15 }
   0xb   :  { %76 = vperm.xlu1 %232, %v68_v5  }
   0xc   :  { %p240_p3 = por %p239_p2, %p238_p1 }
   0xe   :  { %88 = vperm.xlu0 %230, %v85_v6   ;;  %p241_p4 = pnand %p240_p3, %p234_p0 }
   0xf   :  { %141 = vperm.xlu1 %232, %v138_v7  }
  0x81   :  { %v53_v17 = vpop.permute.xlu1 %52  ;;  %v38_v18 = vpop.permute.xlu0 %37 }
  0x82   :  { %v63_v19 = vmul.f32 %v62_v15, %v53_v17  ;;  %v49_v20 = vmul.f32 %v48_v16, %v38_v18 }
  0x84   :  { %v65_v25 = vadd.f32 %v63_v19, %v49_v20 }
  0x85   :  { %v57_v21 = vpop.permute.xlu1 %56  ;;  %v43_v22 = vpop.permute.xlu0 %42 }
  0x86   :  { %v64_v23 = vmul.f32 %v62_v15, %v57_v21  ;;  %v50_v24 = vmul.f32 %v48_v16, %v43_v22 }
  0x88   :  { %v66_v26 = vadd.f32 %v64_v23, %v50_v24 }
  0x89   :  { %v72_v27 = vpop.permute.xlu0 %71 }
  0x8a   :  { %v79_v28 = vadd.f32 %v72_v27, %v65_v25  ;;  %v77_v29 = vpop.permute.xlu1 %76 }
  0x8b   :  { %v80_v30 = vadd.f32 %v77_v29, %v66_v26 }
  0x8c   :  { %v81_v31 = vmax.f32 %v79_v28, 0.0 }
  0x8d   :  { %v82_v32 = vmax.f32 %v80_v30, 0.0  ;;  %v89_v35 = vpop.permute.xlu0 %88 }
  0x8e   :  { %v142_v45 = vpop.permute.xlu1 %141 }
  0x8f   :  { %v84_v33 = vpack.c.bf16 %v82_v32, %v81_v31 }
  0x91   :  { %214 = vmatpush3.bf16.msra.mxu0 %v84_v33 }
  0x94   :  { %216 = vmatmul.mubr.msk.bf16.vlgmr.msra.gmra.mrb[0].mxu0 %vm91_vm1, %v83_v34 }
 0x167   :  { %v129_v36 = vpop.f32.mrb[0].mxu0 }
 0x168   :  { %v130_v37 = vadd.f32 %v129_v36, %v89_v35  ;;  %v217_v38 = vpop.f32.mrb[1].mxu0 }
 0x169   :  { %v132_v39 = vpop.f32.mrb[2].mxu0 }
 0x16a   :  { %v135_v40 = vmax.f32 %v130_v37, 0.0  ;;  %v218_v41 = vpop.f32.mrb[3].mxu0 }
 0x16c   :  { %v137_v42 = vpack.c.bf16 %v135_v40, %v135_v40 }
 0x16e   :  { %v150_v43 = vsel %vm148_vm2, %v137_v42, 0 }
 0x16f   :  { %220 = vmatpush3.bf16.msra.mxu1 %v150_v43 }
 0x172   :  { %222 = vmatmul.mubr.msk.bf16.vlgmr.msra.gmra.mrb[0].mxu1 %vm144_vm3, %v136_v44 }
 0x245   :  { %v186_v46 = vpop.f32.mrb[0].mxu1 }
 0x246   :  { %v187_v47 = vadd.f32 %v186_v46, %v142_v45  ;;  %v223_v48 = vpop.f32.mrb[1].mxu1 }
 0x247   :  { %v189_v49 = vpop.f32.mrb[2].mxu1 }
 0x248   :  { %192 = vst [vmem:[#allocation2] sm:$0x7] %v187_v47  ;;  %v224_v50 = vpop.f32.mrb[3].mxu1 }
 0x249   :  { %244 = shalt.err (!%p241_p4)
}
 0x24a   :  { %s245_s17 = scalar_lea.hbm %s348_s7, 64 }
 0x24b   :  { %p246_p5 = scmp.ne.s32.totalorder %s348_s7, %s245_s17  ;;  %p249_p6 = scmp.lt.u32.totalorder %s245_s17, %s348_s7 }
 0x24d   :  { %p251_p7 = pnand %p249_p6, %p246_p5 }
 0x24f   :  { %254 = shalt.err (!%p251_p7)
}
 0x250   :  { %202 = dma.vmem_to_hbm [thread:$0]  %s200_s14, 64, %s348_s7, [#allocation3]  }
 0x251   :  { %255 = dma.done.wait [#allocation3], 64  }
 0x252   :  { %256 = vsyncadd [#allocation3], 4294967232 }
 0x253   :  { %206 = vsyncpa [#allocation3], 1 }

</bundles_post_ra>
